<compile_context>
chip_gen: v6e
topology: v6e:2x2x1
jax: 0.10.0
libtpu: 0.0.40
codegen_flags: <defaults>
</compile_context>

<pallas_src>
import functools

import jax
import jax.numpy as jnp
from jax.experimental import pallas as pl
from jax.experimental.pallas import tpu as pltpu


def _expm_kernel(x_ref, o_ref, *, inv_scale, n_squarings, taylor_order,
                 ps_block, use_bf16):
    n = x_ref.shape[-1]
    # Single fused scaling: (X / k_steps) / 2^n_squarings.
    A = x_ref[...].reshape(n, n).astype(jnp.float32) * inv_scale

    # Identity built once (stays out of the matmul chain).
    row = jax.lax.broadcasted_iota(jnp.int32, (n, n), 0)
    col = jax.lax.broadcasted_iota(jnp.int32, (n, n), 1)
    eye = jnp.where(row == col, 1.0, 0.0).astype(jnp.float32)

    mm_dtype = jnp.bfloat16 if use_bf16 else jnp.float32

    def mm_taylor(a, b):
        # Taylor-stage matmul: bf16 MXU inputs, f32 accumulation.
        return jnp.dot(a.astype(mm_dtype), b.astype(mm_dtype),
                       preferred_element_type=jnp.float32)

    # ---- Paterson-Stockmeyer evaluation of sum_{k<=m} A^k / k! ----
    q = max(2, min(ps_block, taylor_order))
    # Powers A^1..A^q.  For q=4: A^3 = A*A^2 and A^4 = A^2*A^2 only depend on
    # A^2, so those two matmuls are independent and overlap in the pipeline.
    powers = [eye, A]
    for k in range(2, q + 1):
        half = k // 2
        powers.append(mm_taylor(powers[half], powers[k - half]))

    # Inverse factorials folded into the block coefficients.
    inv_fact = [1.0]
    for j in range(1, taylor_order + 1):
        inv_fact.append(inv_fact[-1] / j)

    def block(j):
        lo = j * q
        hi = min(lo + q - 1, taylor_order)
        B = inv_fact[lo] * eye
        for i in range(1, hi - lo + 1):
            B = B + inv_fact[lo + i] * powers[i]
        return B

    r = taylor_order // q
    Aq = powers[q]
    if taylor_order % q == 0 and r >= 1:
        # Top block is just c_m * I: fold it in directly, saving one matmul.
        T = block(r - 1) + inv_fact[taylor_order] * Aq
        start_j = r - 2
    else:
        T = block(r)
        start_j = r - 1
    for j in range(start_j, -1, -1):
        T = mm_taylor(Aq, T) + block(j)

    # ---- Squaring phase in f32 (errors here are amplified by ~2^s) ----
    for _ in range(n_squarings):
        T = jnp.dot(T, T, preferred_element_type=jnp.float32)

    o_ref[...] = T.reshape(o_ref.shape).astype(o_ref.dtype)


def matrix_exponential(X, k_steps, *, n_squarings=6, taylor_order=8,
                       ps_block=4, use_bf16=True):
    """Pallas equivalent of MatrixExponential(k_steps, latent_features).forward(X).

    Accepts a single (n, n) matrix (module semantics) or a batched (B, n, n)
    stack; the batched path marks the grid axis "parallel" (v7x megacore).
    """
    assert X.ndim in (2, 3) and X.shape[-1] == X.shape[-2], "expects square matrices"
    n = X.shape[-1]
    kernel = functools.partial(
        _expm_kernel,
        inv_scale=1.0 / (float(k_steps) * (2.0 ** n_squarings)),
        n_squarings=n_squarings,
        taylor_order=taylor_order,
        ps_block=ps_block,
        use_bf16=use_bf16,
    )

    if X.ndim == 2:
        # One resident (n, n) tile: no grid, whole-array VMEM blocks.
        return pl.pallas_call(
            kernel,
            out_shape=jax.ShapeDtypeStruct((n, n), X.dtype),
            in_specs=[pl.BlockSpec(memory_space=pltpu.MemorySpace.VMEM)],
            out_specs=pl.BlockSpec(memory_space=pltpu.MemorySpace.VMEM),
        )(X)

    B = X.shape[0]
    return pl.pallas_call(
        kernel,
        out_shape=jax.ShapeDtypeStruct((B, n, n), X.dtype),
        grid=(B,),
        in_specs=[pl.BlockSpec((1, n, n), lambda b: (b, 0, 0))],
        out_specs=pl.BlockSpec((1, n, n), lambda b: (b, 0, 0)),
        compiler_params=pltpu.CompilerParams(
            dimension_semantics=("parallel",)),
    )(X)


if __name__ == "__main__":
    # Module config (matches MatrixExponential(k_steps, latent_features)).
    k_steps = 4
    latent_features = 32

    key = jax.random.PRNGKey(0)
    X = jax.random.normal(key, (latent_features, latent_features), dtype=jnp.float32)

    out = jax.block_until_ready(matrix_exponential(X, k_steps))

    # Reference: same semantics as torch.matrix_exp(X / k_steps).
    ref = jax.block_until_ready(jax.scipy.linalg.expm(X / k_steps))
    scale = float(jnp.max(jnp.abs(ref))) + 1e-6
    max_err = float(jnp.max(jnp.abs(out - ref)))
    if max_err / scale > 1e-2:
        raise AssertionError(f"matrix_exp mismatch: max_err={max_err}, scale={scale}")

    # Batched path (grid axis marked "parallel" -> split across TCs on v7x).
    Xb = jax.random.normal(jax.random.PRNGKey(1),
                           (4, latent_features, latent_features), dtype=jnp.float32)
    outb = jax.block_until_ready(matrix_exponential(Xb, k_steps))
    for b in range(Xb.shape[0]):
        ref_b = jax.scipy.linalg.expm(Xb[b] / k_steps)
        scale_b = float(jnp.max(jnp.abs(ref_b))) + 1e-6
        err_b = float(jnp.max(jnp.abs(outb[b] - ref_b)))
        if err_b / scale_b > 1e-2:
            raise AssertionError(
                f"batched matrix_exp mismatch at b={b}: err={err_b}, scale={scale_b}")

    print("KERNEL_OK")
</pallas_src>

<mosaic_0001>
module attributes {stable_mosaic.version = 11 : i64} {
  func.func @_expm_kernel(%arg0: memref<32x32xf32, #tpu.memory_space<vmem>>, %arg1: memref<32x32xf32, #tpu.memory_space<vmem>>) attributes {dimension_semantics = [], scalar_prefetch = 0 : i64, scratch_operands = 0 : i64, tpu.core_type = #tpu.core_type<tc>} {
    %c0 = arith.constant 0 : index
    %c0_0 = arith.constant 0 : index
    %0 = vector.load %arg0[%c0, %c0_0] : memref<32x32xf32, #tpu.memory_space<vmem>>, vector<32x32xf32>
    %cst = arith.constant 3.906250e-03 : f32
    %1 = vector.broadcast %cst : f32 to vector<32x32xf32>
    %2 = arith.mulf %0, %1 : vector<32x32xf32>
    %3 = tpu.iota {dimensions = array<i32: 0>} : vector<32x32xi32>
    %4 = tpu.iota {dimensions = array<i32: 1>} : vector<32x32xi32>
    %5 = arith.cmpi eq, %3, %4 : vector<32x32xi32>
    %cst_1 = arith.constant 1.000000e+00 : f32
    %cst_2 = arith.constant 0.000000e+00 : f32
    %6 = vector.broadcast %cst_1 : f32 to vector<32x32xf32>
    %7 = vector.broadcast %cst_2 : f32 to vector<32x32xf32>
    %8 = arith.select %5, %6, %7 : vector<32x32xi1>, vector<32x32xf32>
    %9 = arith.truncf %2 : vector<32x32xf32> to vector<32x32xbf16>
    %10 = arith.truncf %2 : vector<32x32xf32> to vector<32x32xbf16>
    %cst_3 = arith.constant dense<0.000000e+00> : vector<32x32xf32>
    %11 = tpu.matmul %9, %10, %cst_3 {dimension_numbers = #tpu.dot_dimension_numbers<[1], [0], [0], [1], [0, 0, 1, 1], [], []>} : vector<32x32xbf16>, vector<32x32xbf16>, vector<32x32xf32> -> vector<32x32xf32>
    %12 = arith.truncf %2 : vector<32x32xf32> to vector<32x32xbf16>
    %13 = arith.truncf %11 : vector<32x32xf32> to vector<32x32xbf16>
    %cst_4 = arith.constant dense<0.000000e+00> : vector<32x32xf32>
    %14 = tpu.matmul %12, %13, %cst_4 {dimension_numbers = #tpu.dot_dimension_numbers<[1], [0], [0], [1], [0, 0, 1, 1], [], []>} : vector<32x32xbf16>, vector<32x32xbf16>, vector<32x32xf32> -> vector<32x32xf32>
    %15 = arith.truncf %11 : vector<32x32xf32> to vector<32x32xbf16>
    %16 = arith.truncf %11 : vector<32x32xf32> to vector<32x32xbf16>
    %cst_5 = arith.constant dense<0.000000e+00> : vector<32x32xf32>
    %17 = tpu.matmul %15, %16, %cst_5 {dimension_numbers = #tpu.dot_dimension_numbers<[1], [0], [0], [1], [0, 0, 1, 1], [], []>} : vector<32x32xbf16>, vector<32x32xbf16>, vector<32x32xf32> -> vector<32x32xf32>
    %cst_6 = arith.constant 0.0416666679 : f32
    %18 = vector.broadcast %cst_6 : f32 to vector<32x32xf32>
    %19 = arith.mulf %18, %8 : vector<32x32xf32>
    %cst_7 = arith.constant 0.00833333377 : f32
    %20 = vector.broadcast %cst_7 : f32 to vector<32x32xf32>
    %21 = arith.mulf %20, %2 : vector<32x32xf32>
    %22 = arith.addf %19, %21 : vector<32x32xf32>
    %cst_8 = arith.constant 0.00138888892 : f32
    %23 = vector.broadcast %cst_8 : f32 to vector<32x32xf32>
    %24 = arith.mulf %23, %11 : vector<32x32xf32>
    %25 = arith.addf %22, %24 : vector<32x32xf32>
    %cst_9 = arith.constant 1.98412701E-4 : f32
    %26 = vector.broadcast %cst_9 : f32 to vector<32x32xf32>
    %27 = arith.mulf %26, %14 : vector<32x32xf32>
    %28 = arith.addf %25, %27 : vector<32x32xf32>
    %cst_10 = arith.constant 2.48015876E-5 : f32
    %29 = vector.broadcast %cst_10 : f32 to vector<32x32xf32>
    %30 = arith.mulf %29, %17 : vector<32x32xf32>
    %31 = arith.addf %28, %30 : vector<32x32xf32>
    %32 = arith.truncf %17 : vector<32x32xf32> to vector<32x32xbf16>
    %33 = arith.truncf %31 : vector<32x32xf32> to vector<32x32xbf16>
    %cst_11 = arith.constant dense<0.000000e+00> : vector<32x32xf32>
    %34 = tpu.matmul %32, %33, %cst_11 {dimension_numbers = #tpu.dot_dimension_numbers<[1], [0], [0], [1], [0, 0, 1, 1], [], []>} : vector<32x32xbf16>, vector<32x32xbf16>, vector<32x32xf32> -> vector<32x32xf32>
    %cst_12 = arith.constant 1.000000e+00 : f32
    %35 = vector.broadcast %cst_12 : f32 to vector<32x32xf32>
    %36 = arith.mulf %35, %8 : vector<32x32xf32>
    %cst_13 = arith.constant 1.000000e+00 : f32
    %37 = vector.broadcast %cst_13 : f32 to vector<32x32xf32>
    %38 = arith.mulf %37, %2 : vector<32x32xf32>
    %39 = arith.addf %36, %38 : vector<32x32xf32>
    %cst_14 = arith.constant 5.000000e-01 : f32
    %40 = vector.broadcast %cst_14 : f32 to vector<32x32xf32>
    %41 = arith.mulf %40, %11 : vector<32x32xf32>
    %42 = arith.addf %39, %41 : vector<32x32xf32>
    %cst_15 = arith.constant 0.166666672 : f32
    %43 = vector.broadcast %cst_15 : f32 to vector<32x32xf32>
    %44 = arith.mulf %43, %14 : vector<32x32xf32>
    %45 = arith.addf %42, %44 : vector<32x32xf32>
    %46 = arith.addf %34, %45 : vector<32x32xf32>
    %cst_16 = arith.constant dense<0.000000e+00> : vector<32x32xf32>
    %47 = tpu.matmul %46, %46, %cst_16 {dimension_numbers = #tpu.dot_dimension_numbers<[1], [0], [0], [1], [0, 0, 1, 1], [], []>} : vector<32x32xf32>, vector<32x32xf32>, vector<32x32xf32> -> vector<32x32xf32>
    %cst_17 = arith.constant dense<0.000000e+00> : vector<32x32xf32>
    %48 = tpu.matmul %47, %47, %cst_17 {dimension_numbers = #tpu.dot_dimension_numbers<[1], [0], [0], [1], [0, 0, 1, 1], [], []>} : vector<32x32xf32>, vector<32x32xf32>, vector<32x32xf32> -> vector<32x32xf32>
    %cst_18 = arith.constant dense<0.000000e+00> : vector<32x32xf32>
    %49 = tpu.matmul %48, %48, %cst_18 {dimension_numbers = #tpu.dot_dimension_numbers<[1], [0], [0], [1], [0, 0, 1, 1], [], []>} : vector<32x32xf32>, vector<32x32xf32>, vector<32x32xf32> -> vector<32x32xf32>
    %cst_19 = arith.constant dense<0.000000e+00> : vector<32x32xf32>
    %50 = tpu.matmul %49, %49, %cst_19 {dimension_numbers = #tpu.dot_dimension_numbers<[1], [0], [0], [1], [0, 0, 1, 1], [], []>} : vector<32x32xf32>, vector<32x32xf32>, vector<32x32xf32> -> vector<32x32xf32>
    %cst_20 = arith.constant dense<0.000000e+00> : vector<32x32xf32>
    %51 = tpu.matmul %50, %50, %cst_20 {dimension_numbers = #tpu.dot_dimension_numbers<[1], [0], [0], [1], [0, 0, 1, 1], [], []>} : vector<32x32xf32>, vector<32x32xf32>, vector<32x32xf32> -> vector<32x32xf32>
    %cst_21 = arith.constant dense<0.000000e+00> : vector<32x32xf32>
    %52 = tpu.matmul %51, %51, %cst_21 {dimension_numbers = #tpu.dot_dimension_numbers<[1], [0], [0], [1], [0, 0, 1, 1], [], []>} : vector<32x32xf32>, vector<32x32xf32>, vector<32x32xf32> -> vector<32x32xf32>
    %c0_22 = arith.constant 0 : index
    %c0_23 = arith.constant 0 : index
    %53 = vector.load %arg1[%c0_22, %c0_23] : memref<32x32xf32, #tpu.memory_space<vmem>>, vector<32x32xf32>
    tpu.vector_store %arg1[%c0_22, %c0_23], %52 {strides = array<i32>} : memref<32x32xf32, #tpu.memory_space<vmem>>, vector<32x32xf32>,
    return
  }
}

</mosaic_0001>

<bundles_post_ra>
// kernel: tpu_custom_call.1
= control target key start
LH: loop header
LB: loop body
LE: loop exit
PB: predicated region body
PF: predicated region fallthrough
CT: control target
= control target key end

     0   :  { %6 = vsyncpa [#allocation3], 0  ;;  %s1263_s0 = inlined_call_operand.hbm [shape: f32[32,32], index: 0, kind: input, shape index: {}]   ;;  %s1264_s1 = inlined_call_operand.hbm [shape: f32[32,32], index: 1, kind: output, shape index: {}]  }
   0x1   :  { %7 = vsyncpa [#allocation4], 0  ;;  %s1190_s6 = smov [#allocation2]  }
   0x2   :  { %s13_s7 = sshll.u32 %s1190_s6, 4  ;;  %s14_s7 = int_to_ptr.vmem [resolvable:$true] %s13_s7 }
   0x3   :  { %s1154_s8 = scalar_lea.vmem %s14_s7, 512  ;;  %p1159_p1 = scmp.lt.s32.totalorder %s14_s7, %s14_s7 }
   0x4   :  { %p1155_p0 = scmp.ne.s32.totalorder %s14_s7, %s1154_s8  ;;  %p1160_p2 = scmp.lt.s32.totalorder %s1154_s8, %s1154_s8 }
   0x6   :  { %p1161_p3 = por %p1160_p2, %p1159_p1 }
   0x8   :  { %p1162_p4 = pnand %p1161_p3, %p1155_p0 }
   0xa   :  { %1165 = shalt.err (!%p1162_p4)
}
   0xb   :  { %s1191_s9 = smov 128   ;;  %s1192_s10 = smov 8  }
   0xc   :  { %19 = dma.hbm_to_vmem [thread:$0]  %s1263_s0, 512, %s14_s7, [#allocation3], %s1191_s9, %s1191_s9, %s1192_s10  }
   0xd   :  { %1186 = dma.done.wait [#allocation3], 512  }
   0xe   :  { %1187 = vsyncadd [#allocation3], 4294966784  ;;  %v26_v0 = vld [vmem:[#allocation2 + $0x10] sm:$0xff]  ;;  %v27_v1 = vld [vmem:[#allocation2 + $0x18] sm:$0xff]  ;;  %vm49_vm0 = vcmask 261120   ;;  %v32_v10 = vlaneseq  ;;  %v1193_v15 = vmov 0.0  }
   0xf   :  { %v24_v2 = vld [vmem:[#allocation2] sm:$0xff]  ;;  %v30_v3 = vmul.f32 0.00390625, %v26_v0  ;;  %v31_v4 = vmul.f32 0.00390625, %v27_v1  ;;  %v25_v5 = vld [vmem:[#allocation2 + $0x8] sm:$0xff]  ;;  %s1194_s0 = smov [#allocation5]  }
  0x10   :  { %v28_v6 = vmul.f32 0.00390625, %v24_v2  ;;  %v1211_v7 = vmul.f32 0.00390625, %v25_v5  ;;  %v33_v11 = vshrl.u32 %v32_v10, 7  ;;  %v38_v13 = vand.u32 127, %v32_v10  ;;  %s917_s13 = sshll.u32 %s1194_s0, 4  ;;  %s918_s13 = int_to_ptr.vmem [resolvable:$true] %s917_s13 }
  0x11   :  { %v48_v8 = vpack.c.bf16 %v31_v4, %v30_v3  ;;  %v217_v36 = vmul.f32 0.008333334, %v30_v3  ;;  %v218_v41 = vmul.f32 0.008333334, %v31_v4  ;;  %s1166_s14 = scalar_lea.vmem %s918_s13, 512  ;;  %p1171_p6 = scmp.lt.s32.totalorder %s918_s13, %s918_s13 }
  0x12   :  { %v47_v9 = vpack.c.bf16 %v1211_v7, %v28_v6  ;;  %v35_v12 = vadd.s32 16, %v33_v11  ;;  %v36_v14 = vadd.s32 24, %v33_v11  ;;  %vm39_vm2 = vcmp.eq.s32.totalorder %v33_v11, %v38_v13  ;;  %p1167_p5 = scmp.ne.s32.totalorder %s918_s13, %s1166_s14  ;;  %p1172_p7 = scmp.lt.s32.totalorder %s1166_s14, %s1166_s14 }
  0x13   :  { %1025 = vmatprep.subr.bf16.mxu0 %v48_v8  ;;  %v43_v20 = vsel %vm39_vm2, 1.0, %v1193_v15  ;;  %v34_v34 = vadd.s32 8, %v33_v11  ;;  %v215_v39 = vmul.f32 0.008333334, %v28_v6  ;;  %v216_v43 = vmul.f32 0.008333334, %v1211_v7 }
  0x14   :  { %1026 = vmatpush3.bf16.msra.mxu0 %v48_v8  ;;  %1029 = vmatprep.mubr.msk.bf16.mxu0 %vm49_vm0, %v47_v9  ;;  %vm41_vm1 = vcmp.eq.s32.totalorder %v35_v12, %v38_v13  ;;  %vm42_vm3 = vcmp.eq.s32.totalorder %v36_v14, %v38_v13  ;;  %v251_v22 = vadd.f32 %v43_v20, %v28_v6  ;;  %v211_v38 = vmul.f32 0.041666668, %v43_v20  ;;  %p1173_p8 = por %p1172_p7, %p1171_p6 }
  0x15   :  { %1027 = vmatprep.subr.bf16.mxu0 %v47_v9  ;;  %1037 = vmatprep.mubr.msk.bf16.mxu1 %vm49_vm0, %v47_v9  ;;  %v45_v16 = vsel %vm41_vm1, 1.0, %v1193_v15  ;;  %v46_v24 = vsel %vm42_vm3, 1.0, %v1193_v15  ;;  %vm40_vm4 = vcmp.eq.s32.totalorder %v34_v34, %v38_v13 }
  0x16   :  { %v253_v17 = vadd.f32 %v45_v16, %v30_v3  ;;  %v254_v27 = vadd.f32 %v46_v24, %v31_v4  ;;  %v213_v35 = vmul.f32 0.041666668, %v45_v16  ;;  %v44_v37 = vsel %vm40_vm4, 1.0, %v1193_v15  ;;  %p1174_p9 = pnand %p1173_p8, %p1167_p5 }
  0x17   :  { %v214_v40 = vmul.f32 0.041666668, %v46_v24  ;;  %v212_v42 = vmul.f32 0.041666668, %v44_v37  ;;  %v219_v46 = vadd.f32 %v215_v39, %v211_v38 }
  0x18   :  { %1028 = vmatpush3.bf16.msra.mxu0 %v47_v9  ;;  %v221_v44 = vadd.f32 %v217_v36, %v213_v35 }
  0x19   :  { %v222_v50 = vadd.f32 %v218_v41, %v214_v40  ;;  %v220_v54 = vadd.f32 %v216_v43, %v212_v42 }
  0x1b   :  { %1030 = vmatmul.mubr.msk.bf16.vlgmr.msra.gmra.mxu0 %vm49_vm0, %v48_v8 }
  0xdb   :  { %v1031_v18 = vpop.f32.mrf.mxu0 }
  0xdc   :  { %v257_v19 = vmul.f32 0.5, %v1031_v18  ;;  %v225_v45 = vmul.f32 0.0013888889, %v1031_v18 }
  0xdd   :  { %v90_v21 = vpop.f32.mrf.mxu0 }
  0xde   :  { %v255_v23 = vmul.f32 0.5, %v90_v21  ;;  %v261_v25 = vadd.f32 %v257_v19, %v253_v17  ;;  %v223_v47 = vmul.f32 0.0013888889, %v90_v21  ;;  %v229_v58 = vadd.f32 %v225_v45, %v221_v44 }
  0xdf   :  { %v1032_v26 = vpop.f32.mrf.mxu0 }
  0xe0   :  { %v106_v28 = vpack.c.bf16 %v1032_v26, %v1031_v18  ;;  %v258_v29 = vmul.f32 0.5, %v1032_v26  ;;  %v259_v31 = vadd.f32 %v255_v23, %v251_v22  ;;  %v226_v51 = vmul.f32 0.0013888889, %v1032_v26 }
  0xe1   :  { %v1217_v30 = vpop.f32.mrf.mxu0  ;;  %v227_v61 = vadd.f32 %v223_v47, %v219_v46 }
  0xe2   :  { %v105_v32 = vpack.c.bf16 %v1217_v30, %v90_v21  ;;  %1033 = vmatprep.subr.bf16.mxu1 %v106_v28  ;;  %1041 = vmatprep.subr.bf16.mxu0 %v106_v28  ;;  %v262_v33 = vadd.f32 %v258_v29, %v254_v27  ;;  %v224_v55 = vmul.f32 0.0013888889, %v1217_v30  ;;  %v230_v1 = vadd.f32 %v226_v51, %v222_v50 }
  0xe3   :  { %1034 = vmatpush3.bf16.msra.mxu1 %v106_v28  ;;  %1042 = vmatpush3.bf16.msra.mxu0 %v106_v28  ;;  %v252_v29 = vadd.f32 %v44_v37, %v1211_v7 }
  0xe4   :  { %1035 = vmatprep.subr.bf16.mxu1 %v105_v32  ;;  %1043 = vmatprep.subr.bf16.mxu0 %v105_v32  ;;  %v228_v5 = vadd.f32 %v224_v55, %v220_v54 }
  0xe5   :  { %1045 = vmatprep.mubr.msk.bf16.mxu0 %vm49_vm0, %v105_v32 }
  0xe7   :  { %1036 = vmatpush3.bf16.msra.mxu1 %v105_v32  ;;  %1044 = vmatpush3.bf16.msra.mxu0 %v105_v32 }
  0xea   :  { %1038 = vmatmul.mubr.msk.bf16.vlgmr.msra.gmra.mxu1 %vm49_vm0, %v48_v8  ;;  %1046 = vmatmul.mubr.msk.bf16.vlgmr.msra.gmra.mxu0 %vm49_vm0, %v106_v28  ;;  %v256_v28 = vmul.f32 0.5, %v1217_v30 }
  0xec   :  { %v260_v36 = vadd.f32 %v256_v28, %v252_v29 }
 0x1aa   :  { %v1039_v48 = vpop.f32.mrf.mxu1  ;;  %v1047_v49 = vpop.f32.mrf.mxu0 }
 0x1ab   :  { %v233_v52 = vmul.f32 0.0001984127, %v1039_v48  ;;  %v265_v53 = vmul.f32 0.16666667, %v1039_v48  ;;  %v241_v6 = vmul.f32 2.4801588e-05, %v1047_v49 }
 0x1ac   :  { %v141_v56 = vpop.f32.mrf.mxu1  ;;  %v196_v57 = vpop.f32.mrf.mxu0 }
 0x1ad   :  { %v231_v59 = vmul.f32 0.0001984127, %v141_v56  ;;  %v263_v60 = vmul.f32 0.16666667, %v141_v56  ;;  %v269_v0 = vadd.f32 %v265_v53, %v261_v25  ;;  %v237_v2 = vadd.f32 %v233_v52, %v229_v58 }
 0x1ae   :  { %v1040_v62 = vpop.f32.mrf.mxu1  ;;  %v1048_v63 = vpop.f32.mrf.mxu0  ;;  %v239_v15 = vmul.f32 2.4801588e-05, %v196_v57 }
 0x1af   :  { %v234_v3 = vmul.f32 0.0001984127, %v1040_v62  ;;  %v266_v4 = vmul.f32 0.16666667, %v1040_v62  ;;  %v267_v10 = vadd.f32 %v263_v60, %v259_v31  ;;  %v235_v11 = vadd.f32 %v231_v59, %v227_v61 }
 0x1b0   :  { %v144_v8 = vpop.f32.mrf.mxu1  ;;  %v199_v9 = vpop.f32.mrf.mxu0  ;;  %v242_v13 = vmul.f32 2.4801588e-05, %v1048_v63  ;;  %v245_v18 = vadd.f32 %v241_v6, %v237_v2  ;;  %v248_v26 = vpack.c.bf16 %v1048_v63, %v1047_v49 }
 0x1b1   :  { %v238_v12 = vadd.f32 %v234_v3, %v230_v1  ;;  %v232_v14 = vmul.f32 0.0001984127, %v144_v8  ;;  %v247_v16 = vpack.c.bf16 %v199_v9, %v196_v57  ;;  %v270_v17 = vadd.f32 %v266_v4, %v262_v33 }
 0x1b2   :  { %v240_v21 = vmul.f32 2.4801588e-05, %v199_v9  ;;  %v243_v22 = vadd.f32 %v239_v15, %v235_v11  ;;  %v264_v32 = vmul.f32 0.16666667, %v144_v8 }
 0x1b3   :  { %v246_v19 = vadd.f32 %v242_v13, %v238_v12  ;;  %v236_v20 = vadd.f32 %v232_v14, %v228_v5  ;;  %1053 = vmatprep.mubr.msk.bf16.mxu1 %vm49_vm0, %v247_v16 }
 0x1b4   :  { %v268_v40 = vadd.f32 %v264_v32, %v260_v36 }
 0x1b5   :  { %v244_v23 = vadd.f32 %v240_v21, %v236_v20  ;;  %v250_v24 = vpack.c.bf16 %v246_v19, %v245_v18 }
 0x1b7   :  { %1049 = vmatprep.subr.bf16.mxu1 %v250_v24  ;;  %v249_v25 = vpack.c.bf16 %v244_v23, %v243_v22 }
 0x1b8   :  { %1050 = vmatpush3.bf16.msra.mxu1 %v250_v24 }
 0x1b9   :  { %1051 = vmatprep.subr.bf16.mxu1 %v249_v25 }
 0x1bc   :  { %1052 = vmatpush3.bf16.msra.mxu1 %v249_v25 }
 0x1bf   :  { %1054 = vmatmul.mubr.msk.bf16.vlgmr.msra.gmra.mxu1 %vm49_vm0, %v248_v26 }
 0x27f   :  { %v1055_v27 = vpop.f32.mrf.mxu1 }
 0x280   :  { %v320_v39 = vadd.f32 %v1055_v27, %v269_v0 }
 0x281   :  { %v311_v31 = vpop.f32.mrf.mxu1 }
 0x282   :  { %v312_v33 = vadd.f32 %v311_v31, %v267_v10 }
 0x283   :  { %v1056_v34 = vpop.f32.mrf.mxu1 }
 0x284   :  { %v323_v35 = vadd.f32 %v1056_v34, %v270_v17  ;;  %1065 = vmatprep.mubr.msk.f32.mxu0 %vm49_vm0, %v312_v33 }
 0x285   :  { %v314_v38 = vpop.f32.mrf.mxu1 }
 0x286   :  { %1057 = vmatprep.subr.mxu0 %v323_v35  ;;  %v315_v41 = vadd.f32 %v314_v38, %v268_v40 }
 0x287   :  { %1058 = vmatpush3.msra.mxu0 %v323_v35 }
 0x288   :  { %1059 = vmatprep.subr.mxu0 %v320_v39 }
 0x289   :  { %1060 = vmatpush3.msra.mxu0 %v320_v39 }
 0x28a   :  { %1061 = vmatprep.subr.mxu0 %v315_v41 }
 0x28b   :  { %1062 = vmatpush3.msra.mxu0 %v315_v41 }
 0x28c   :  { %1063 = vmatprep.subr.mxu0 %v312_v33 }
 0x28d   :  { %1064 = vmatpush3.msra.mxu0 %v312_v33 }
 0x28e   :  { %1066 = vmatmul.mubr.msk.f32.vlgmr.msra.gmra.mxu0 %vm49_vm0, %v315_v41 }
 0x28f   :  { %1068 = vmatprep.mubr.msk.f32.mxu0 %vm49_vm0, %v320_v39 }
 0x292   :  { %1069 = vmatmul.mubr.msk.f32.gmra.mxu0 %vm49_vm0, %v323_v35 }
 0x34e   :  { %v1067_v7 = vpop.f32.mrf.mxu0 }
 0x350   :  { %v404_v30 = vpop.f32.mrf.mxu0 }
 0x351   :  { %1079 = vmatprep.mubr.msk.f32.mxu1 %vm49_vm0, %v404_v30 }
 0x352   :  { %v1070_v37 = vpop.f32.mrf.mxu0 }
 0x353   :  { %1071 = vmatprep.subr.mxu1 %v1070_v37 }
 0x354   :  { %v414_v42 = vpop.f32.mrf.mxu0  ;;  %1072 = vmatpush3.msra.mxu1 %v1070_v37 }
 0x355   :  { %1073 = vmatprep.subr.mxu1 %v414_v42 }
 0x356   :  { %1074 = vmatpush3.msra.mxu1 %v414_v42 }
 0x357   :  { %1075 = vmatprep.subr.mxu1 %v1067_v7 }
 0x358   :  { %1076 = vmatpush3.msra.mxu1 %v1067_v7 }
 0x359   :  { %1077 = vmatprep.subr.mxu1 %v404_v30 }
 0x35a   :  { %1078 = vmatpush3.msra.mxu1 %v404_v30 }
 0x35b   :  { %1080 = vmatmul.mubr.msk.f32.vlgmr.msra.gmra.mxu1 %vm49_vm0, %v1067_v7 }
 0x35c   :  { %1082 = vmatprep.mubr.msk.f32.mxu1 %vm49_vm0, %v414_v42 }
 0x35f   :  { %1083 = vmatmul.mubr.msk.f32.gmra.mxu1 %vm49_vm0, %v1070_v37 }
 0x41b   :  { %v1081_v43 = vpop.f32.mrf.mxu1 }
 0x41d   :  { %v501_v44 = vpop.f32.mrf.mxu1 }
 0x41e   :  { %1093 = vmatprep.mubr.msk.f32.mxu0 %vm49_vm0, %v501_v44 }
 0x41f   :  { %v1084_v45 = vpop.f32.mrf.mxu1 }
 0x420   :  { %1085 = vmatprep.subr.mxu0 %v1084_v45 }
 0x421   :  { %v511_v46 = vpop.f32.mrf.mxu1  ;;  %1086 = vmatpush3.msra.mxu0 %v1084_v45 }
 0x422   :  { %1087 = vmatprep.subr.mxu0 %v511_v46 }
 0x423   :  { %1088 = vmatpush3.msra.mxu0 %v511_v46 }
 0x424   :  { %1089 = vmatprep.subr.mxu0 %v1081_v43 }
 0x425   :  { %1090 = vmatpush3.msra.mxu0 %v1081_v43 }
 0x426   :  { %1091 = vmatprep.subr.mxu0 %v501_v44 }
 0x427   :  { %1092 = vmatpush3.msra.mxu0 %v501_v44 }
 0x428   :  { %1094 = vmatmul.mubr.msk.f32.vlgmr.msra.gmra.mxu0 %vm49_vm0, %v1081_v43 }
 0x429   :  { %1096 = vmatprep.mubr.msk.f32.mxu0 %vm49_vm0, %v511_v46 }
 0x42c   :  { %1097 = vmatmul.mubr.msk.f32.gmra.mxu0 %vm49_vm0, %v1084_v45 }
 0x4e8   :  { %v1095_v47 = vpop.f32.mrf.mxu0 }
 0x4ea   :  { %v598_v48 = vpop.f32.mrf.mxu0 }
 0x4eb   :  { %1107 = vmatprep.mubr.msk.f32.mxu1 %vm49_vm0, %v598_v48 }
 0x4ec   :  { %v1098_v49 = vpop.f32.mrf.mxu0 }
 0x4ed   :  { %1099 = vmatprep.subr.mxu1 %v1098_v49 }
 0x4ee   :  { %v608_v50 = vpop.f32.mrf.mxu0  ;;  %1100 = vmatpush3.msra.mxu1 %v1098_v49 }
 0x4ef   :  { %1101 = vmatprep.subr.mxu1 %v608_v50 }
 0x4f0   :  { %1102 = vmatpush3.msra.mxu1 %v608_v50 }
 0x4f1   :  { %1103 = vmatprep.subr.mxu1 %v1095_v47 }
 0x4f2   :  { %1104 = vmatpush3.msra.mxu1 %v1095_v47 }
 0x4f3   :  { %1105 = vmatprep.subr.mxu1 %v598_v48 }
 0x4f4   :  { %1106 = vmatpush3.msra.mxu1 %v598_v48 }
 0x4f5   :  { %1108 = vmatmul.mubr.msk.f32.vlgmr.msra.gmra.mxu1 %vm49_vm0, %v1095_v47 }
 0x4f6   :  { %1110 = vmatprep.mubr.msk.f32.mxu1 %vm49_vm0, %v608_v50 }
 0x4f9   :  { %1111 = vmatmul.mubr.msk.f32.gmra.mxu1 %vm49_vm0, %v1098_v49 }
 0x5b5   :  { %v1109_v51 = vpop.f32.mrf.mxu1 }
 0x5b7   :  { %v695_v52 = vpop.f32.mrf.mxu1 }
 0x5b8   :  { %1121 = vmatprep.mubr.msk.f32.mxu0 %vm49_vm0, %v695_v52 }
 0x5b9   :  { %v1112_v53 = vpop.f32.mrf.mxu1 }
 0x5ba   :  { %1113 = vmatprep.subr.mxu0 %v1112_v53 }
 0x5bb   :  { %v705_v54 = vpop.f32.mrf.mxu1  ;;  %1114 = vmatpush3.msra.mxu0 %v1112_v53 }
 0x5bc   :  { %1115 = vmatprep.subr.mxu0 %v705_v54 }
 0x5bd   :  { %1116 = vmatpush3.msra.mxu0 %v705_v54 }
 0x5be   :  { %1117 = vmatprep.subr.mxu0 %v1109_v51 }
 0x5bf   :  { %1118 = vmatpush3.msra.mxu0 %v1109_v51 }
 0x5c0   :  { %1119 = vmatprep.subr.mxu0 %v695_v52 }
 0x5c1   :  { %1120 = vmatpush3.msra.mxu0 %v695_v52 }
 0x5c2   :  { %1122 = vmatmul.mubr.msk.f32.vlgmr.msra.gmra.mxu0 %vm49_vm0, %v1109_v51 }
 0x5c3   :  { %1124 = vmatprep.mubr.msk.f32.mxu0 %vm49_vm0, %v705_v54 }
 0x5c6   :  { %1125 = vmatmul.mubr.msk.f32.gmra.mxu0 %vm49_vm0, %v1112_v53 }
 0x682   :  { %v1123_v55 = vpop.f32.mrf.mxu0 }
 0x684   :  { %v792_v56 = vpop.f32.mrf.mxu0 }
 0x685   :  { %1135 = vmatprep.mubr.msk.f32.mxu1 %vm49_vm0, %v792_v56 }
 0x686   :  { %v1126_v57 = vpop.f32.mrf.mxu0 }
 0x687   :  { %1127 = vmatprep.subr.mxu1 %v1126_v57 }
 0x688   :  { %v802_v58 = vpop.f32.mrf.mxu0  ;;  %1128 = vmatpush3.msra.mxu1 %v1126_v57 }
 0x689   :  { %1129 = vmatprep.subr.mxu1 %v802_v58 }
 0x68a   :  { %1130 = vmatpush3.msra.mxu1 %v802_v58 }
 0x68b   :  { %1131 = vmatprep.subr.mxu1 %v1123_v55 }
 0x68c   :  { %1132 = vmatpush3.msra.mxu1 %v1123_v55 }
 0x68d   :  { %1133 = vmatprep.subr.mxu1 %v792_v56 }
 0x68e   :  { %1134 = vmatpush3.msra.mxu1 %v792_v56 }
 0x68f   :  { %1136 = vmatmul.mubr.msk.f32.vlgmr.msra.gmra.mxu1 %vm49_vm0, %v1123_v55 }
 0x690   :  { %1138 = vmatprep.mubr.msk.f32.mxu1 %vm49_vm0, %v802_v58 }
 0x693   :  { %1139 = vmatmul.mubr.msk.f32.gmra.mxu1 %vm49_vm0, %v1126_v57 }
 0x74f   :  { %v1137_v59 = vpop.f32.mrf.mxu1 }
 0x750   :  { %909 = vst.msk [vmem:[#allocation5 + $0x8] sm:$0xff] %vm49_vm0, %v1137_v59 }
 0x751   :  { %v889_v60 = vpop.f32.mrf.mxu1 }
 0x752   :  { %908 = vst.msk [vmem:[#allocation5] sm:$0xff] %vm49_vm0, %v889_v60 }
 0x753   :  { %v1140_v61 = vpop.f32.mrf.mxu1 }
 0x754   :  { %911 = vst.msk [vmem:[#allocation5 + $0x18] sm:$0xff] %vm49_vm0, %v1140_v61 }
 0x755   :  { %v899_v62 = vpop.f32.mrf.mxu1 }
 0x756   :  { %910 = vst.msk [vmem:[#allocation5 + $0x10] sm:$0xff] %vm49_vm0, %v899_v62 }
 0x757   :  { %1177 = shalt.err (!%p1174_p9)
}
 0x758   :  { %923 = dma.vmem_to_hbm [thread:$0]  %s918_s13, 512, %s1264_s1, [#allocation4], %s1191_s9, %s1191_s9, %s1192_s10  }
 0x759   :  { %1188 = dma.done.wait [#allocation4], 512  }
 0x75a   :  { %1189 = vsyncadd [#allocation4], 4294966784 }
 0x75b   :  { %927 = vsyncpa [#allocation3], 1 }
 0x75c   :  { %928 = vsyncpa [#allocation4], 1 }

</bundles_post_ra>
